<compile_context>
chip_gen: v7x
topology: tpu7x:2x2x1
jax: 0.10.0
libtpu: 0.0.40
codegen_flags: <defaults>
</compile_context>

<pallas_src>
import jax
import jax.numpy as jnp
from jax.experimental import pallas as pl
from jax.experimental.pallas import tpu as pltpu


def _lwc_kernel(emb_ref, comm_ref, mask_ref,
                w12_ref, w1c_ref, b_ref, wout_ref, bo_ref,
                out_ref):
    hp = w1c_ref.shape[1]                      # padded hidden width (multiple of 128)

    # Fused first layer: columns [:hp] belong to `lins` (branch 1, emb part of
    # the folded concat), columns [hp:] to `lins2` (branch 2).
    h = jnp.dot(emb_ref[...], w12_ref[...], preferred_element_type=jnp.float32)
    hc = jnp.dot(comm_ref[...], w1c_ref[...], preferred_element_type=jnp.float32)

    a1 = jnp.maximum(h[:, :hp] + hc + b_ref[0:1, :], 0.0)   # lins hidden  (ReLU)
    a2 = jnp.maximum(h[:, hp:] + b_ref[1:2, :], 0.0)        # lins2 hidden (ReLU)

    # 1-column output layer as VPU multiply + lane reduction (keeps MXU free).
    p1 = jnp.sum(a1 * wout_ref[0:1, :], axis=-1, keepdims=True) + bo_ref[0]
    p2 = jnp.sum(a2 * wout_ref[1:2, :], axis=-1, keepdims=True) + bo_ref[1]

    # Row-wise selection (replaces pred[index1]=pred1 ; pred[index2]=pred2).
    out_ref[...] = jnp.where(mask_ref[...] > 0.5, p1, p2)


def _round_up(x, m):
    return ((x + m - 1) // m) * m


def _prepare_params(params, compute_dtype):
    """Pad H -> Hp (multiple of 128) with zeros and pack weights for the kernel."""
    w1e, w1c, b1, w1o, b1o, w2, b2, w2o, b2o = params
    E, H = w1e.shape
    Hp = _round_up(H, 128)
    padc = lambda w: jnp.pad(w, ((0, 0), (0, Hp - H)))   # pad hidden columns
    padr = lambda w: jnp.pad(w, ((0, Hp - H), (0, 0)))   # pad hidden rows

    w12 = jnp.concatenate([padc(w1e), padc(w2)], axis=1).astype(compute_dtype)    # [E, 2Hp]
    w1c_p = padc(w1c).astype(compute_dtype)                                       # [E, Hp]
    b = jnp.concatenate([padc(b1), padc(b2)], axis=0).astype(jnp.float32)         # [2, Hp]
    wout = jnp.concatenate([padr(w1o), padr(w2o)], axis=1).T.astype(jnp.float32)  # [2, Hp]
    bo = jnp.concatenate([b1o.reshape(-1), b2o.reshape(-1)]).astype(jnp.float32)  # (2,) scalars
    return w12, w1c_p, b, wout, bo, Hp


def linear_with_community(emb, community_emd, use_index, params, *,
                          tn=512, compute_dtype=jnp.bfloat16):
    """emb, community_emd: [N, E] float32; use_index: [N] bool.  Returns [N] float32."""
    N, E = emb.shape
    w12, w1c, b, wout, bo, Hp = _prepare_params(params, compute_dtype)

    # Row tile: as large as requested, multiple of 16 (bf16 sublane packing),
    # capped so tiny problems are not padded far past N.  For v7x megacore,
    # prefer a tn such that the resulting grid length is even.
    tn = max(16, (tn // 16) * 16)
    tn = min(tn, _round_up(N, 16))
    n_pad = _round_up(N, tn)
    pad_rows = n_pad - N

    emb_p = jnp.pad(emb, ((0, pad_rows), (0, 0))).astype(compute_dtype)
    comm_p = jnp.pad(community_emd, ((0, pad_rows), (0, 0))).astype(compute_dtype)
    mask = jnp.pad(use_index.astype(jnp.float32), ((0, pad_rows),)).reshape(n_pad, 1)

    row = lambda last: pl.BlockSpec((tn, last), lambda i: (i, 0))   # tiled over rows
    whole = lambda shape: pl.BlockSpec(shape, lambda i: (0, 0))     # weight resident across steps

    out = pl.pallas_call(
        _lwc_kernel,
        out_shape=jax.ShapeDtypeStruct((n_pad, 1), jnp.float32),
        grid_spec=pltpu.PrefetchScalarGridSpec(
            num_scalar_prefetch=0,
            grid=(n_pad // tn,),
            in_specs=[
                row(E),                      # emb        [tn, E]   (compute_dtype)
                row(E),                      # community  [tn, E]   (compute_dtype)
                row(1),                      # mask       [tn, 1]   (f32)
                whole((E, 2 * Hp)),          # W12 = [w1e | w2]     (compute_dtype)
                whole((E, Hp)),              # w1c                  (compute_dtype)
                whole((2, Hp)),              # [b1 ; b2]            (f32)
                whole((2, Hp)),              # [w1o ; w2o] as rows  (f32)
                pl.BlockSpec(memory_space=pltpu.MemorySpace.SMEM),  # [b1o, b2o] scalars
            ],
            out_specs=pl.BlockSpec((tn, 1), lambda i: (i, 0)),
        ),
        compiler_params=pltpu.CompilerParams(
            dimension_semantics=("parallel",),      # row axis shards across TCs (v7x)
            vmem_limit_bytes=64 * 1024 * 1024,      # fits v5e/v6e/v7x; allows large tn
        ),
    )(emb_p, comm_p, mask, w12, w1c, b, wout, bo)
    return out[:N, 0]


def init_params(key, emb_dim):
    """Deterministic synthetic parameters matching the torch module's shapes.

    torch shapes: lins[0].weight  [E/2, 2E] -> stored transposed & split into
                  w1e [E, E/2] (emb half), w1c [E, E/2] (community half)
                  lins[2].weight  [1, E/2]  -> w1o [E/2, 1]
                  lins2[0].weight [E/2, E]  -> w2  [E, E/2]
                  lins2[2].weight [1, E/2]  -> w2o [E/2, 1]
    """
    E, H = emb_dim, emb_dim // 2
    ks = jax.random.split(key, 9)
    s = 0.1
    w1e = jax.random.normal(ks[0], (E, H), jnp.float32) * s
    w1c = jax.random.normal(ks[1], (E, H), jnp.float32) * s
    b1 = jax.random.normal(ks[2], (1, H), jnp.float32) * s
    w1o = jax.random.normal(ks[3], (H, 1), jnp.float32) * s
    b1o = jax.random.normal(ks[4], (1, 1), jnp.float32) * s
    w2 = jax.random.normal(ks[5], (E, H), jnp.float32) * s
    b2 = jax.random.normal(ks[6], (1, H), jnp.float32) * s
    w2o = jax.random.normal(ks[7], (H, 1), jnp.float32) * s
    b2o = jax.random.normal(ks[8], (1, 1), jnp.float32) * s
    return (w1e, w1c, b1, w1o, b1o, w2, b2, w2o, b2o)


def _reference(emb, comm, use_index, params):
    """Pure-JAX fp32 reference matching the torch module math."""
    w1e, w1c, b1, w1o, b1o, w2, b2, w2o, b2o = params
    h1 = jnp.maximum(emb @ w1e + comm @ w1c + b1, 0.0)
    p1 = (h1 @ w1o + b1o)[:, 0]
    h2 = jnp.maximum(emb @ w2 + b2, 0.0)
    p2 = (h2 @ w2o + b2o)[:, 0]
    return jnp.where(use_index, p1, p2)


if __name__ == "__main__":
    N, E = 8, 32  # small shapes: 8 nodes, emb_dim=32
    key = jax.random.PRNGKey(0)
    k_emb, k_comm, k_mask, k_par = jax.random.split(key, 4)

    emb = jax.random.normal(k_emb, (N, E), jnp.float32)
    community_emd = jax.random.normal(k_comm, (N, E), jnp.float32)
    use_index = jax.random.bernoulli(k_mask, 0.5, (N,))  # bool mask
    params = init_params(k_par, E)

    pred = linear_with_community(emb, community_emd, use_index, params)
    pred = jax.block_until_ready(pred)

    ref = _reference(emb, community_emd, use_index, params)
    assert pred.shape == (N,)
    # bf16 streaming of activations/first-layer weights -> loosened tolerance
    # vs. the fp32 reference (accumulation is still f32).
    assert jnp.allclose(pred, ref, atol=2e-2, rtol=2e-2), (pred, ref)
    print("KERNEL_OK")
</pallas_src>

<mosaic_0001>
module attributes {stable_mosaic.version = 11 : i64} {
  func.func @_lwc_kernel(%arg0: i32, %arg1: memref<16x32xbf16, #tpu.memory_space<vmem>>, %arg2: memref<16x32xbf16, #tpu.memory_space<vmem>>, %arg3: memref<16x1xf32, #tpu.memory_space<vmem>>, %arg4: memref<32x256xbf16, #tpu.memory_space<vmem>>, %arg5: memref<32x128xbf16, #tpu.memory_space<vmem>>, %arg6: memref<2x128xf32, #tpu.memory_space<vmem>>, %arg7: memref<2x128xf32, #tpu.memory_space<vmem>>, %arg8: memref<2xf32, #tpu.memory_space<smem>>, %arg9: memref<16x1xf32, #tpu.memory_space<vmem>>) attributes {dimension_semantics = [#tpu.dimension_semantics<parallel>], iteration_bounds = array<i64: 1>, scalar_prefetch = 0 : i64, scratch_operands = 0 : i64, tpu.core_type = #tpu.core_type<tc>, window_params = [{transform_indices = @transform_0, window_bounds = array<i64: 16, 32>}, {transform_indices = @transform_1, window_bounds = array<i64: 16, 32>}, {transform_indices = @transform_2, window_bounds = array<i64: 16, 1>}, {pipeline_mode = #tpu.pipeline_mode<synchronous>, transform_indices = @transform_3, window_bounds = array<i64: 32, 256>}, {pipeline_mode = #tpu.pipeline_mode<synchronous>, transform_indices = @transform_4, window_bounds = array<i64: 32, 128>}, {pipeline_mode = #tpu.pipeline_mode<synchronous>, transform_indices = @transform_5, window_bounds = array<i64: 2, 128>}, {pipeline_mode = #tpu.pipeline_mode<synchronous>, transform_indices = @transform_6, window_bounds = array<i64: 2, 128>}, {transform_indices = @transform_7, window_bounds = array<i64: 2>}, {transform_indices = @transform_8, window_bounds = array<i64: 16, 1>}]} {
    %c0 = arith.constant 0 : index
    %c0_0 = arith.constant 0 : index
    %0 = vector.load %arg1[%c0, %c0_0] : memref<16x32xbf16, #tpu.memory_space<vmem>>, vector<16x32xbf16>
    %c0_1 = arith.constant 0 : index
    %c0_2 = arith.constant 0 : index
    %1 = vector.load %arg4[%c0_1, %c0_2] : memref<32x256xbf16, #tpu.memory_space<vmem>>, vector<32x256xbf16>
    %cst = arith.constant dense<0.000000e+00> : vector<16x256xf32>
    %2 = tpu.matmul %0, %1, %cst {dimension_numbers = #tpu.dot_dimension_numbers<[1], [0], [0], [1], [0, 0, 1, 1], [], []>} : vector<16x32xbf16>, vector<32x256xbf16>, vector<16x256xf32> -> vector<16x256xf32>
    %c0_3 = arith.constant 0 : index
    %c0_4 = arith.constant 0 : index
    %3 = vector.load %arg2[%c0_3, %c0_4] : memref<16x32xbf16, #tpu.memory_space<vmem>>, vector<16x32xbf16>
    %c0_5 = arith.constant 0 : index
    %c0_6 = arith.constant 0 : index
    %4 = vector.load %arg5[%c0_5, %c0_6] : memref<32x128xbf16, #tpu.memory_space<vmem>>, vector<32x128xbf16>
    %cst_7 = arith.constant dense<0.000000e+00> : vector<16x128xf32>
    %5 = tpu.matmul %3, %4, %cst_7 {dimension_numbers = #tpu.dot_dimension_numbers<[1], [0], [0], [1], [0, 0, 1, 1], [], []>} : vector<16x32xbf16>, vector<32x128xbf16>, vector<16x128xf32> -> vector<16x128xf32>
    %6 = vector.extract_strided_slice %2 {offsets = [0, 0], sizes = [16, 128], strides = [1, 1]} : vector<16x256xf32> to vector<16x128xf32>
    %7 = arith.addf %6, %5 : vector<16x128xf32>
    %c0_8 = arith.constant 0 : index
    %c0_9 = arith.constant 0 : index
    %8 = vector.load %arg6[%c0_8, %c0_9] : memref<2x128xf32, #tpu.memory_space<vmem>>, vector<1x128xf32>
    %9 = vector.broadcast %8 : vector<1x128xf32> to vector<16x128xf32>
    %10 = arith.addf %7, %9 : vector<16x128xf32>
    %cst_10 = arith.constant 0.000000e+00 : f32
    %11 = vector.broadcast %cst_10 : f32 to vector<16x128xf32>
    %12 = arith.maximumf %10, %11 : vector<16x128xf32>
    %13 = vector.extract_strided_slice %2 {offsets = [0, 128], sizes = [16, 128], strides = [1, 1]} : vector<16x256xf32> to vector<16x128xf32>
    %c1 = arith.constant 1 : index
    %c0_11 = arith.constant 0 : index
    %14 = vector.load %arg6[%c1, %c0_11] : memref<2x128xf32, #tpu.memory_space<vmem>>, vector<1x128xf32>
    %15 = vector.broadcast %14 : vector<1x128xf32> to vector<16x128xf32>
    %16 = arith.addf %13, %15 : vector<16x128xf32>
    %cst_12 = arith.constant 0.000000e+00 : f32
    %17 = vector.broadcast %cst_12 : f32 to vector<16x128xf32>
    %18 = arith.maximumf %16, %17 : vector<16x128xf32>
    %c0_13 = arith.constant 0 : index
    %c0_14 = arith.constant 0 : index
    %19 = vector.load %arg7[%c0_13, %c0_14] : memref<2x128xf32, #tpu.memory_space<vmem>>, vector<1x128xf32>
    %20 = vector.broadcast %19 : vector<1x128xf32> to vector<16x128xf32>
    %21 = arith.mulf %12, %20 : vector<16x128xf32>
    %cst_15 = arith.constant dense<0.000000e+00> : vector<16xf32>
    %22 = vector.multi_reduction <add>, %21, %cst_15 [1] : vector<16x128xf32> to vector<16xf32>
    %23 = vector.shape_cast %22 : vector<16xf32> to vector<16x1xf32>
    %c0_16 = arith.constant 0 : index
    %24 = memref.load %arg8[%c0_16] : memref<2xf32, #tpu.memory_space<smem>>
    %25 = vector.broadcast %24 : f32 to vector<16x1xf32>
    %26 = arith.addf %23, %25 : vector<16x1xf32>
    %c1_17 = arith.constant 1 : index
    %c0_18 = arith.constant 0 : index
    %27 = vector.load %arg7[%c1_17, %c0_18] : memref<2x128xf32, #tpu.memory_space<vmem>>, vector<1x128xf32>
    %28 = vector.broadcast %27 : vector<1x128xf32> to vector<16x128xf32>
    %29 = arith.mulf %18, %28 : vector<16x128xf32>
    %cst_19 = arith.constant dense<0.000000e+00> : vector<16xf32>
    %30 = vector.multi_reduction <add>, %29, %cst_19 [1] : vector<16x128xf32> to vector<16xf32>
    %31 = vector.shape_cast %30 : vector<16xf32> to vector<16x1xf32>
    %c1_20 = arith.constant 1 : index
    %32 = memref.load %arg8[%c1_20] : memref<2xf32, #tpu.memory_space<smem>>
    %33 = vector.broadcast %32 : f32 to vector<16x1xf32>
    %34 = arith.addf %31, %33 : vector<16x1xf32>
    %c0_21 = arith.constant 0 : index
    %c0_22 = arith.constant 0 : index
    %35 = vector.load %arg3[%c0_21, %c0_22] : memref<16x1xf32, #tpu.memory_space<vmem>>, vector<16x1xf32>
    %cst_23 = arith.constant 5.000000e-01 : f32
    %36 = vector.broadcast %cst_23 : f32 to vector<16x1xf32>
    %37 = arith.cmpf ogt, %35, %36 : vector<16x1xf32>
    %38 = arith.select %37, %26, %34 : vector<16x1xi1>, vector<16x1xf32>
    %c0_24 = arith.constant 0 : index
    %c0_25 = arith.constant 0 : index
    %39 = vector.load %arg9[%c0_24, %c0_25] : memref<16x1xf32, #tpu.memory_space<vmem>>, vector<16x1xf32>
    tpu.vector_store %arg9[%c0_24, %c0_25], %38 {strides = array<i32>} : memref<16x1xf32, #tpu.memory_space<vmem>>, vector<16x1xf32>,
    return
  }
  func.func @transform_0(%arg0: i32) -> (i32, i32) {
    %c0_i32 = arith.constant 0 : i32
    %c0_i32_0 = arith.constant 0 : i32
    return %arg0, %c0_i32 : i32, i32
  }
  func.func @transform_1(%arg0: i32) -> (i32, i32) {
    %c0_i32 = arith.constant 0 : i32
    %c0_i32_0 = arith.constant 0 : i32
    return %arg0, %c0_i32 : i32, i32
  }
  func.func @transform_2(%arg0: i32) -> (i32, i32) {
    %c0_i32 = arith.constant 0 : i32
    %c0_i32_0 = arith.constant 0 : i32
    return %arg0, %c0_i32 : i32, i32
  }
  func.func @transform_3(%arg0: i32) -> (i32, i32) {
    %c0_i32 = arith.constant 0 : i32
    %c0_i32_0 = arith.constant 0 : i32
    %c0_i32_1 = arith.constant 0 : i32
    return %c0_i32, %c0_i32_0 : i32, i32
  }
  func.func @transform_4(%arg0: i32) -> (i32, i32) {
    %c0_i32 = arith.constant 0 : i32
    %c0_i32_0 = arith.constant 0 : i32
    %c0_i32_1 = arith.constant 0 : i32
    return %c0_i32, %c0_i32_0 : i32, i32
  }
  func.func @transform_5(%arg0: i32) -> (i32, i32) {
    %c0_i32 = arith.constant 0 : i32
    %c0_i32_0 = arith.constant 0 : i32
    %c0_i32_1 = arith.constant 0 : i32
    return %c0_i32, %c0_i32_0 : i32, i32
  }
  func.func @transform_6(%arg0: i32) -> (i32, i32) {
    %c0_i32 = arith.constant 0 : i32
    %c0_i32_0 = arith.constant 0 : i32
    %c0_i32_1 = arith.constant 0 : i32
    return %c0_i32, %c0_i32_0 : i32, i32
  }
  func.func @transform_7(%arg0: i32) -> i32 {
    %c0_i32 = arith.constant 0 : i32
    %c0_i32_0 = arith.constant 0 : i32
    return %c0_i32 : i32
  }
  func.func @transform_8(%arg0: i32) -> (i32, i32) {
    %c0_i32 = arith.constant 0 : i32
    %c0_i32_0 = arith.constant 0 : i32
    return %arg0, %c0_i32 : i32, i32
  }
}

</mosaic_0001>

<bundles_post_ra>
// kernel: tpu_custom_call.1
= control target key start
LH: loop header
LB: loop body
LE: loop exit
PB: predicated region body
PF: predicated region fallthrough
CT: control target
= control target key end

     0   :  { %13 = vsyncpa [#allocation3], 0  ;;  %s795_s0 = inlined_call_operand.hbm [shape: bf16[16,32], index: 0, kind: input, shape index: {}]   ;;  %s796_s1 = inlined_call_operand.hbm [shape: bf16[16,32], index: 1, kind: input, shape index: {}]   ;;  %s797_s2 = inlined_call_operand.hbm [shape: f32[16,1], index: 2, kind: input, shape index: {}]   ;;  %s798_s3 = inlined_call_operand.hbm [shape: bf16[32,256], index: 3, kind: input, shape index: {}]   ;;  %s799_s4 = inlined_call_operand.hbm [shape: bf16[32,128], index: 4, kind: input, shape index: {}]   ;;  %s800_s5 = inlined_call_operand.hbm [shape: f32[2,128], index: 5, kind: input, shape index: {}]   ;;  %s801_s6 = inlined_call_operand.hbm [shape: f32[2,128], index: 6, kind: input, shape index: {}]   ;;  %s802_s7 = inlined_call_operand.hbm [shape: f32[2], index: 7, kind: input, shape index: {}]   ;;  %s803_s8 = inlined_call_operand.hbm [shape: f32[16,1], index: 8, kind: output, shape index: {}]  }
   0x1   :  { %14 = vsyncpa [#allocation7], 0 }
   0x2   :  { %15 = vsyncpa [#allocation10], 0 }
   0x3   :  { %16 = vsyncpa [#allocation13], 0 }
   0x4   :  { %17 = vsyncpa [#allocation5], 0 }
   0x5   :  { %18 = vsyncpa [#allocation4], 0  ;;  %s608_s27 = smov [#allocation6]   ;;  %s410_s9 = scalar_lea.hbm %s796_s1, 128 }
   0x6   :  { %s36_s28 = sshll.u32 %s608_s27, 4  ;;  %p411_p0 = scmp.ne.s32.totalorder %s796_s1, %s410_s9  ;;  %s37_s28 = int_to_ptr.vmem [resolvable:$true] %s36_s28 }
   0x7   :  { %p414_p1 = scmp.lt.u32.totalorder %s410_s9, %s796_s1 }
   0x9   :  { %p416_p2 = pnand %p414_p1, %p411_p0 }
   0xb   :  { %419 = shalt.err (!%p416_p2)
}
   0xc   :  { %s420_s14 = scalar_lea.vmem %s37_s28, 128  ;;  %p425_p4 = scmp.lt.s32.totalorder %s37_s28, %s37_s28 }
   0xd   :  { %p421_p3 = scmp.ne.s32.totalorder %s37_s28, %s420_s14  ;;  %p426_p5 = scmp.lt.s32.totalorder %s420_s14, %s420_s14 }
   0xf   :  { %p427_p6 = por %p426_p5, %p425_p4 }
  0x11   :  { %p428_p7 = pnand %p427_p6, %p421_p3 }
  0x13   :  { %431 = shalt.err (!%p428_p7)
}
  0x14   :  { %s609_s15 = smov 64   ;;  %s610_s16 = smov 4  }
  0x15   :  { %42 = dma.hbm_to_vmem [thread:$0]  %s796_s1, 128, %s37_s28, [#allocation7], %s609_s15, %s609_s15, %s610_s16  }
  0x16   :  { %s611_s19 = smov [#allocation9]   ;;  %s612_s21 = smov [#allocation12]  }
  0x17   :  { %s60_s20 = sshll.u32 %s611_s19, 4  ;;  %s85_s22 = sshll.u32 %s612_s21, 4  ;;  %s61_s20 = int_to_ptr.vmem [resolvable:$true] %s60_s20  ;;  %s86_s22 = int_to_ptr.vmem [resolvable:$true] %s85_s22 }
  0x18   :  { %s432_s25 = scalar_lea.hbm %s798_s3, 512 }
  0x19   :  { %p433_p8 = scmp.ne.s32.totalorder %s798_s3, %s432_s25  ;;  %p436_p9 = scmp.lt.u32.totalorder %s432_s25, %s798_s3 }
  0x1b   :  { %p438_p10 = pnand %p436_p9, %p433_p8 }
  0x1d   :  { %441 = shalt.err (!%p438_p10)
}
  0x1e   :  { %s442_s1 = scalar_lea.vmem %s61_s20, 512  ;;  %p447_p12 = scmp.lt.s32.totalorder %s61_s20, %s61_s20 }
  0x1f   :  { %p443_p11 = scmp.ne.s32.totalorder %s61_s20, %s442_s1  ;;  %p448_p13 = scmp.lt.s32.totalorder %s442_s1, %s442_s1 }
  0x21   :  { %p449_p0 = por %p448_p13, %p447_p12 }
  0x23   :  { %p450_p1 = pnand %p449_p0, %p443_p11 }
  0x25   :  { %453 = shalt.err (!%p450_p1)
}
  0x26   :  { %s613_s28 = smov 128   ;;  %s614_s9 = smov 8  }
  0x27   :  { %66 = dma.hbm_to_vmem [thread:$0]  %s798_s3, 512, %s61_s20, [#allocation10], %s613_s28, %s613_s28, %s614_s9  }
  0x28   :  { %s454_s14 = scalar_lea.hbm %s800_s5, 32 }
  0x29   :  { %p455_p2 = scmp.ne.s32.totalorder %s800_s5, %s454_s14  ;;  %p458_p3 = scmp.lt.u32.totalorder %s454_s14, %s800_s5 }
  0x2b   :  { %p460_p4 = pnand %p458_p3, %p455_p2 }
  0x2d   :  { %463 = shalt.err (!%p460_p4)
}
  0x2e   :  { %s464_s23 = scalar_lea.vmem %s86_s22, 32  ;;  %p469_p6 = scmp.lt.s32.totalorder %s86_s22, %s86_s22 }
  0x2f   :  { %p465_p5 = scmp.ne.s32.totalorder %s86_s22, %s464_s23  ;;  %p470_p7 = scmp.lt.s32.totalorder %s464_s23, %s464_s23 }
  0x31   :  { %p471_p8 = por %p470_p7, %p469_p6 }
  0x33   :  { %p472_p9 = pnand %p471_p8, %p465_p5 }
  0x35   :  { %475 = shalt.err (!%p472_p9)
}
  0x36   :  { %88 = dma.hbm_to_vmem [thread:$0]  %s800_s5, 32, %s86_s22, [#allocation13]  }
  0x37   :  { %s615_s24 = smov [#allocation2]   ;;  %s616_s26 = smov [#allocation8]  }
  0x38   :  { %s24_s25 = sshll.u32 %s615_s24, 4  ;;  %s48_s27 = sshll.u32 %s616_s26, 4  ;;  %s25_s25 = int_to_ptr.vmem [resolvable:$true] %s24_s25  ;;  %s49_s27 = int_to_ptr.vmem [resolvable:$true] %s48_s27 }
  0x39   :  { %s476_s1 = scalar_lea.hbm %s795_s0, 128 }
  0x3a   :  { %p477_p10 = scmp.ne.s32.totalorder %s795_s0, %s476_s1  ;;  %p480_p11 = scmp.lt.u32.totalorder %s476_s1, %s795_s0 }
  0x3c   :  { %p482_p12 = pnand %p480_p11, %p477_p10 }
  0x3e   :  { %485 = shalt.err (!%p482_p12)
}
  0x3f   :  { %s486_s5 = scalar_lea.vmem %s25_s25, 128  ;;  %p491_p0 = scmp.lt.s32.totalorder %s25_s25, %s25_s25 }
  0x40   :  { %p487_p13 = scmp.ne.s32.totalorder %s25_s25, %s486_s5  ;;  %p492_p1 = scmp.lt.s32.totalorder %s486_s5, %s486_s5 }
  0x42   :  { %p493_p2 = por %p492_p1, %p491_p0 }
  0x44   :  { %p494_p3 = pnand %p493_p2, %p487_p13 }
  0x46   :  { %497 = shalt.err (!%p494_p3)
}
  0x47   :  { %30 = dma.hbm_to_vmem [thread:$0]  %s795_s0, 128, %s25_s25, [#allocation3], %s609_s15, %s609_s15, %s610_s16  }
  0x48   :  { %s498_s19 = scalar_lea.hbm %s797_s2, 256 }
  0x49   :  { %p499_p4 = scmp.ne.s32.totalorder %s797_s2, %s498_s19  ;;  %p502_p5 = scmp.lt.u32.totalorder %s498_s19, %s797_s2 }
  0x4b   :  { %p504_p6 = pnand %p502_p5, %p499_p4 }
  0x4d   :  { %507 = shalt.err (!%p504_p6)
}
  0x4e   :  { %s508_s24 = scalar_lea.vmem %s49_s27, 256  ;;  %p513_p8 = scmp.lt.s32.totalorder %s49_s27, %s49_s27 }
  0x4f   :  { %p509_p7 = scmp.ne.s32.totalorder %s49_s27, %s508_s24  ;;  %p514_p9 = scmp.lt.s32.totalorder %s508_s24, %s508_s24 }
  0x51   :  { %p515_p10 = por %p514_p9, %p513_p8 }
  0x53   :  { %p516_p11 = pnand %p515_p10, %p509_p7 }
  0x55   :  { %519 = shalt.err (!%p516_p11)
}
  0x56   :  { %54 = dma.hbm_to_vmem [thread:$0]  %s797_s2, 256, %s49_s27, [#allocation7], %s613_s28, %s613_s28, %s614_s9  }
  0x57   :  { %s617_s26 = smov [#allocation11]   ;;  %s618_s30 = smov [#allocation14]  }
  0x58   :  { %s72_s29 = sshll.u32 %s617_s26, 4  ;;  %s95_s1 = sshll.u32 %s618_s30, 4  ;;  %s73_s29 = int_to_ptr.vmem [resolvable:$true] %s72_s29  ;;  %s96_s1 = int_to_ptr.vmem [resolvable:$true] %s95_s1 }
  0x59   :  { %s520_s12 = scalar_lea.hbm %s799_s4, 256 }
  0x5a   :  { %p521_p12 = scmp.ne.s32.totalorder %s799_s4, %s520_s12  ;;  %p524_p13 = scmp.lt.u32.totalorder %s520_s12, %s799_s4 }
  0x5c   :  { %p526_p0 = pnand %p524_p13, %p521_p12 }
  0x5e   :  { %529 = shalt.err (!%p526_p0)
}
  0x5f   :  { %s530_s2 = scalar_lea.vmem %s73_s29, 256  ;;  %p535_p2 = scmp.lt.s32.totalorder %s73_s29, %s73_s29 }
  0x60   :  { %p531_p1 = scmp.ne.s32.totalorder %s73_s29, %s530_s2  ;;  %p536_p3 = scmp.lt.s32.totalorder %s530_s2, %s530_s2 }
  0x62   :  { %p537_p4 = por %p536_p3, %p535_p2 }
  0x64   :  { %p538_p5 = pnand %p537_p4, %p531_p1 }
  0x66   :  { %541 = shalt.err (!%p538_p5)
}
  0x67   :  { %78 = dma.hbm_to_vmem [thread:$0]  %s799_s4, 256, %s73_s29, [#allocation10], %s609_s15, %s609_s15, %s610_s16  }
  0x68   :  { %s542_s21 = scalar_lea.hbm %s801_s6, 32 }
  0x69   :  { %p543_p6 = scmp.ne.s32.totalorder %s801_s6, %s542_s21  ;;  %p546_p7 = scmp.lt.u32.totalorder %s542_s21, %s801_s6 }
  0x6b   :  { %p548_p8 = pnand %p546_p7, %p543_p6 }
  0x6d   :  { %551 = shalt.err (!%p548_p8)
}
  0x6e   :  { %s552_s0 = scalar_lea.vmem %s96_s1, 32  ;;  %p557_p10 = scmp.lt.s32.totalorder %s96_s1, %s96_s1 }
  0x6f   :  { %p553_p9 = scmp.ne.s32.totalorder %s96_s1, %s552_s0  ;;  %p558_p11 = scmp.lt.s32.totalorder %s552_s0, %s552_s0 }
  0x71   :  { %p559_p12 = por %p558_p11, %p557_p10 }
  0x73   :  { %p560_p13 = pnand %p559_p12, %p553_p9 }
  0x75   :  { %563 = shalt.err (!%p560_p13)
}
  0x76   :  { %98 = dma.hbm_to_vmem [thread:$0]  %s801_s6, 32, %s96_s1, [#allocation13]  }
  0x77   :  { %s564_s26 = scalar_lea.hbm %s802_s7, 16 }
  0x78   :  { %p565_p0 = scmp.ne.s32.totalorder %s802_s7, %s564_s26  ;;  %p568_p1 = scmp.lt.u32.totalorder %s564_s26, %s802_s7 }
  0x7a   :  { %p570_p2 = pnand %p568_p1, %p565_p0 }
  0x7c   :  { %573 = shalt.err (!%p570_p2)
}
  0x7d   :  { %s619_s12 = smov [#allocation15]  }
  0x7e   :  { %106 = dma.hbm_to_smem %s802_s7, 16, %s619_s12, [#allocation5]  }
  0x7f   :  { %596 = dma.done.wait [#allocation3], 128  }
  0x80   :  { %597 = vsyncadd [#allocation3], 4294967168 }
  0x81   :  { %598 = dma.done.wait [#allocation7], 384  }
  0x82   :  { %599 = vsyncadd [#allocation7], 4294966912 }
  0x83   :  { %600 = dma.done.wait [#allocation10], 768  }
  0x84   :  { %601 = vsyncadd [#allocation10], 4294966528 }
  0x85   :  { %602 = dma.done.wait [#allocation13], 64  }
  0x86   :  { %603 = vsyncadd [#allocation13], 4294967232 }
  0x87   :  { %604 = dma.done.wait [#allocation5], 16  }
  0x88   :  { %605 = vsyncadd [#allocation5], 4294967280 }
  0x89   :  { %131 = sfence }
  0x8a   :  { %v400_v0 = vld [vmem:[#allocation9 + $0x4] ss:$8 sps:$4 sm:$0xff]   ;;  %v620_v1 = vmov 0.0   ;;  %vm621_vm0 = vmmov 0   ;;  %v403_v3 = vld [vmem:[#allocation9] ss:$8 sps:$4 sm:$0xff]  }
  0x8b   :  { %376 = vmatprep.subr.bf16.mxu1 %v620_v1  ;;  %v402_v2 = vld [vmem:[#allocation11] sm:$0xff]   ;;  %380 = vmatprep.mubr.msk.bf16.mxu1 %vm621_vm0, %v620_v1  ;;  %v622_v4 = vmov 0   ;;  %v404_v5 = vld [vmem:[#allocation9 + $0x14] ss:$8 sps:$4 sm:$0xff]   ;;  %v406_v6 = vld [vmem:[#allocation11 + $0x8] sm:$0xff]   ;;  %vm164_vm1 = vcmask 261120  }
  0x8c   :  { %168 = vmatprep.subr.bf16.mxu0 %v400_v0  ;;  %200 = vmatprep.mubr.bf16.mxu0 %v622_v4  ;;  %v407_v7 = vld [vmem:[#allocation9 + $0x10] ss:$8 sps:$4 sm:$0xff]   ;;  %v408_v8 = vld [vmem:[#allocation6] sm:$0xff]   ;;  %v409_v9 = vld [vmem:[#allocation2] sm:$0xff]   ;;  %s372_s6 = sld [smem:[#allocation15 + $0x1]]  ;;  %s309_s7 = sld [smem:[#allocation15]] }
  0x8d   :  { %377 = vmatpush3.bf16.msra.mxu1 %v402_v2  ;;  %169 = vmatpush1.bf16.msra.mxu0 %v403_v3  ;;  %v369_v11 = vld [vmem:[#allocation12 + $0x1] ss:$0 sm:$0xff]  ;;  %v368_v14 = vld [vmem:[#allocation12] ss:$0 sm:$0xff]  ;;  %v371_v23 = vld [vmem:[#allocation14 + $0x1] ss:$0 sm:$0xff] }
  0x8e   :  { %378 = vmatprep.subr.bf16.mxu1 %v620_v1  ;;  %170 = vmatprep.subr.bf16.mxu0 %v404_v5  ;;  %v370_v27 = vld [vmem:[#allocation14] ss:$0 sm:$0xff]  ;;  %v329_v43 = vld [vmem:[#allocation8 + $0x8] sm:$0xff]  ;;  %vm334_vm3 = vcmask 7168   ;;  %s623_s1 = smov [#allocation16]  }
  0x8f   :  { %v328_v37 = vld [vmem:[#allocation8] sm:$0xff]  ;;  %s342_s22 = sshll.u32 %s623_s1, 4  ;;  %vm331_vm4 = vcmp.gt.f32.partialorder %v329_v43, 0.5  ;;  %s343_s22 = int_to_ptr.vmem [resolvable:$true] %s342_s22 }
  0x90   :  { %vm330_vm2 = vcmp.gt.f32.partialorder %v328_v37, 0.5  ;;  %s574_s14 = scalar_lea.vmem %s343_s22, 256  ;;  %p579_p4 = scmp.lt.s32.totalorder %s343_s22, %s343_s22 }
  0x91   :  { %379 = vmatpush3.bf16.msra.mxu1 %v406_v6  ;;  %171 = vmatpush1.bf16.msra.mxu0 %v407_v7  ;;  %p575_p3 = scmp.ne.s32.totalorder %s343_s22, %s574_s14  ;;  %p580_p5 = scmp.lt.s32.totalorder %s574_s14, %s574_s14 }
  0x92   :  { %v325_v36 = vstv %s372_s6  ;;  %v310_v38 = vstv %s309_s7 }
  0x93   :  { %p581_p6 = por %p580_p5, %p579_p4 }
  0x94   :  { %381 = vmatmul.mubr.msk.bf16.vlgmr.msra.gmra.mrb[0].mxu1 %vm164_vm1, %v408_v8  ;;  %363 = vmatmul.mubr.msk.bf16.vlgmr.msra.gmra.mrb[0].mxu0 %vm164_vm1, %v409_v9 }
  0x95   :  { %p582_p7 = pnand %p581_p6, %p575_p3 }
 0x167   :  { %v271_v10 = vpop.f32.mrb[0].mxu1  ;;  %v202_v12 = vpop.f32.mrb[0].mxu0 }
 0x168   :  { %v382_v13 = vpop.f32.mrb[1].mxu1  ;;  %v278_v15 = vadd.f32 %v271_v10, %v202_v12  ;;  %v204_v16 = vpop.f32.mrb[1].mxu0 }
 0x169   :  { %v274_v17 = vpop.f32.mrb[2].mxu1  ;;  %v294_v18 = vadd.f32 %v369_v11, %v204_v16  ;;  %v206_v19 = vpop.f32.mrb[2].mxu0 }
 0x16a   :  { %v383_v20 = vpop.f32.mrb[3].mxu1  ;;  %v279_v21 = vadd.f32 %v274_v17, %v206_v19  ;;  %v208_v22 = vpop.f32.mrb[3].mxu0  ;;  %v285_v24 = vadd.f32 %v368_v14, %v278_v15 }
 0x16b   :  { %v296_v25 = vmax.f32 %v294_v18, 0.0  ;;  %v295_v26 = vadd.f32 %v369_v11, %v208_v22 }
 0x16c   :  { %v286_v28 = vadd.f32 %v368_v14, %v279_v21  ;;  %v287_v29 = vmax.f32 %v285_v24, 0.0 }
 0x16d   :  { %v297_v30 = vmax.f32 %v295_v26, 0.0  ;;  %v318_v31 = vmul.f32 %v371_v23, %v296_v25 }
 0x16e   :  { %v288_v32 = vmax.f32 %v286_v28, 0.0  ;;  %v303_v33 = vmul.f32 %v370_v27, %v287_v29 }
 0x16f   :  { %320 = vadd.xlane.f32.xlu1 %v318_v31  ;;  %v319_v34 = vmul.f32 %v371_v23, %v297_v30 }
 0x170   :  { %305 = vadd.xlane.f32.xlu0 %v303_v33  ;;  %v304_v35 = vmul.f32 %v370_v27, %v288_v32 }
 0x173   :  { %322 = vadd.xlane.f32.xlu1 %v319_v34 }
 0x174   :  { %307 = vadd.xlane.f32.xlu0 %v304_v35 }
 0x1fc   :  { %v321_v39 = vpop.xlane.xlu1 %320 }
 0x1fd   :  { %v326_v40 = vadd.f32 %v325_v36, %v321_v39  ;;  %v306_v41 = vpop.xlane.xlu0 %305 }
 0x1fe   :  { %v311_v42 = vadd.f32 %v310_v38, %v306_v41 }
 0x200   :  { %v323_v44 = vpop.xlane.xlu1 %322  ;;  %v332_v45 = vsel %vm330_vm2, %v311_v42, %v326_v40 }
 0x201   :  { %v327_v46 = vadd.f32 %v325_v36, %v323_v44  ;;  %v308_v47 = vpop.xlane.xlu0 %307  ;;  %335 = vst.msk [vmem:[#allocation16] sm:$0xff] %vm334_vm3, %v332_v45 }
 0x202   :  { %v312_v48 = vadd.f32 %v310_v38, %v308_v47 }
 0x204   :  { %v333_v49 = vsel %vm331_vm4, %v312_v48, %v327_v46 }
 0x205   :  { %336 = vst.msk [vmem:[#allocation16 + $0x8] sm:$0xff] %vm334_vm3, %v333_v49 }
 0x206   :  { %585 = shalt.err (!%p582_p7)
}
 0x207   :  { %s586_s17 = scalar_lea.hbm %s803_s8, 256 }
 0x208   :  { %p587_p8 = scmp.ne.s32.totalorder %s803_s8, %s586_s17  ;;  %p590_p9 = scmp.lt.u32.totalorder %s586_s17, %s803_s8 }
 0x20a   :  { %p592_p10 = pnand %p590_p9, %p587_p8 }
 0x20c   :  { %595 = shalt.err (!%p592_p10)
}
 0x20d   :  { %348 = dma.vmem_to_hbm [thread:$0]  %s343_s22, 256, %s803_s8, [#allocation4], %s613_s28, %s613_s28, %s614_s9  }
 0x20e   :  { %606 = dma.done.wait [#allocation4], 256  }
 0x20f   :  { %607 = vsyncadd [#allocation4], 4294967040 }
 0x210   :  { %352 = vsyncpa [#allocation3], 1 }
 0x211   :  { %353 = vsyncpa [#allocation7], 1 }
 0x212   :  { %354 = vsyncpa [#allocation10], 1 }
 0x213   :  { %355 = vsyncpa [#allocation13], 1 }
 0x214   :  { %356 = vsyncpa [#allocation4], 1 }
 0x215   :  { %357 = vsyncpa [#allocation5], 1 }

</bundles_post_ra>
